<compile_context>
chip_gen: v7x
topology: tpu7x:2x2x1
jax: 0.10.0
libtpu: 0.0.40
codegen_flags: <defaults>
</compile_context>

<pallas_src>
import functools

import jax
import jax.numpy as jnp
from jax import lax
from jax.experimental import pallas as pl
from jax.experimental.pallas import tpu as pltpu


def _round_up(x, m):
    return ((x + m - 1) // m) * m


def _sublane_multiple(itemsize):
    # Native sublane packing: f32 -> 8, bf16/f16 -> 16, int8/fp8 -> 32.
    return max(8, 32 // int(itemsize))


def _input_vmem_budget_bytes():
    """VMEM budget for the double-buffered input blocks, generation aware."""
    try:
        cap = int(pltpu.get_tpu_info().vmem_capacity_bytes)
    except Exception:
        cap = 64 * 1024 * 1024  # conservative fallback: v7x per-core VMEM
    # Spend ~half of physical VMEM on the double-buffered inputs:
    #   v5e/v6e (128 MiB) -> 64 MiB  (~32 MiB of input DMA per grid step)
    #   v7x      (64 MiB) -> 32 MiB  (~16 MiB per step)
    return min(cap // 2, 64 * 1024 * 1024)


def _choose_tile_b(batch, dim, itemsize, sublane, budget_bytes):
    """Largest batch tile whose double-buffered VMEM footprint fits the budget."""
    d_pad = _round_up(dim, 128)                         # lane-padded VMEM layout
    per_row_bytes = 2 * d_pad * itemsize + 128 * 4      # o1 + o2 + target (f32)
    max_rows = max(sublane, budget_bytes // (2 * per_row_bytes))  # x2 double-buffer
    tile_b = (max_rows // sublane) * sublane
    tile_b = max(sublane, min(tile_b, _round_up(batch, sublane)))
    return int(tile_b)


def _contrastive_loss_kernel(o1_ref, o2_ref, t_ref, out_ref, *,
                             margin, eps, batch, tile_b):
    i = pl.program_id(0)

    # DMA moved the narrow native dtype; the f32 upcast is free VPU work.
    o1 = o1_ref[...].astype(jnp.float32)
    o2 = o2_ref[...].astype(jnp.float32)
    diff = o2 - o1
    distances = jnp.sum(diff * diff, axis=1, keepdims=True)          # (tile_b, 1)

    t = t_ref[...]                                                   # (tile_b, 1) f32
    hinge = jnp.maximum(margin - jnp.sqrt(distances + eps), 0.0)
    per_sample = t * distances + (1.0 - t) * hinge * hinge           # (tile_b, 1)

    # Tail mask (no wrapper padding): rows past the true batch hold garbage.
    # Use a select (jnp.where), not multiplication, so NaN/Inf cannot propagate.
    row = i * tile_b + lax.broadcasted_iota(jnp.int32, (tile_b, 1), 0)
    per_sample = jnp.where(row < batch, per_sample, 0.0)

    # Per-tile partial sum -> this step's own output block. The 0.5 (and 1/B
    # for size_average) is applied in the wrapper.
    out_ref[...] = jnp.sum(per_sample).reshape(1, 1, 1)


def contrastive_loss(output1, output2, target, *, margin, size_average=True,
                     tile_b=None):
    """output1, output2: (B, D) float (any float dtype); target: (B,) {0,1}.
    Returns scalar f32, matching PyTorch ContrastiveLoss.forward."""
    B, D = output1.shape
    eps = 1e-9
    itemsize = jnp.dtype(output1.dtype).itemsize
    sublane = _sublane_multiple(itemsize)

    if tile_b is None:
        tile_b = _choose_tile_b(B, D, itemsize, sublane, _input_vmem_budget_bytes())
    tile_b = max(sublane, _round_up(int(tile_b), sublane))
    tile_b = min(tile_b, _round_up(B, sublane))

    num_tiles = (B + tile_b - 1) // tile_b
    final_scale = (0.5 / B) if size_average else 0.5

    t2d = target.astype(jnp.float32).reshape(B, 1)

    kernel = functools.partial(
        _contrastive_loss_kernel,
        margin=float(margin), eps=float(eps), batch=int(B), tile_b=int(tile_b))

    # VMEM limit: double-buffered inputs (lane-padded layout) + slack.
    d_pad = _round_up(D, 128)
    step_in_bytes = tile_b * (2 * d_pad * itemsize + 128 * 4)
    vmem_limit = max(2 * step_in_bytes + 4 * 1024 * 1024, 16 * 1024 * 1024)

    cost = pl.CostEstimate(
        flops=int(B * (3 * D + 8)),
        transcendentals=int(B),
        bytes_accessed=int(2 * B * D * itemsize + 4 * B + 4 * num_tiles),
    )

    partials = pl.pallas_call(
        kernel,
        out_shape=jax.ShapeDtypeStruct((num_tiles, 1, 1), jnp.float32),
        grid=(num_tiles,),
        in_specs=[
            pl.BlockSpec((tile_b, D), lambda i: (i, 0)),
            pl.BlockSpec((tile_b, D), lambda i: (i, 0)),
            pl.BlockSpec((tile_b, 1), lambda i: (i, 0)),
        ],
        out_specs=pl.BlockSpec((1, 1, 1), lambda i: (i, 0, 0)),
        compiler_params=pltpu.CompilerParams(
            dimension_semantics=("parallel",),
            vmem_limit_bytes=int(vmem_limit),
        ),
        cost_estimate=cost,
    )(output1, output2, t2d)

    return final_scale * jnp.sum(partials)


def _reference(output1, output2, target, margin, size_average=True, eps=1e-9):
    # Pure-JAX reference mirroring the PyTorch module (f32 accumulation).
    o1 = output1.astype(jnp.float32)
    o2 = output2.astype(jnp.float32)
    t = target.astype(jnp.float32)
    distances = jnp.sum((o2 - o1) ** 2, axis=1)
    losses = 0.5 * (
        t * distances
        + (1.0 - t) * jnp.maximum(margin - jnp.sqrt(distances + eps), 0.0) ** 2
    )
    return jnp.mean(losses) if size_average else jnp.sum(losses)


if __name__ == "__main__":
    key = jax.random.PRNGKey(0)
    k1, k2, k3, k4, k5, k6 = jax.random.split(key, 6)

    # --- Test 1: small f32 case (single grid step), size_average=True ---
    B, D = 8, 32
    margin = 1.0
    output1 = jax.random.normal(k1, (B, D), dtype=jnp.float32)
    output2 = jax.random.normal(k2, (B, D), dtype=jnp.float32)
    target = jax.random.bernoulli(k3, 0.5, (B,)).astype(jnp.int32)

    loss = contrastive_loss(output1, output2, target, margin=margin,
                            size_average=True)
    loss = jax.block_until_ready(loss)
    ref = _reference(output1, output2, target, margin, size_average=True)
    assert jnp.allclose(loss, ref, rtol=1e-5, atol=1e-6), (loss, ref)

    # --- Test 2: bf16 inputs, multi-tile grid + in-kernel tail masking,
    #             size_average=False ---
    B2, D2 = 100, 256
    margin2 = 1.25
    o1b = jax.random.normal(k4, (B2, D2), dtype=jnp.float32).astype(jnp.bfloat16)
    o2b = jax.random.normal(k5, (B2, D2), dtype=jnp.float32).astype(jnp.bfloat16)
    tb = jax.random.bernoulli(k6, 0.5, (B2,)).astype(jnp.int32)

    loss2 = contrastive_loss(o1b, o2b, tb, margin=margin2, size_average=False,
                             tile_b=32)   # force 4 grid steps, last one ragged
    loss2 = jax.block_until_ready(loss2)
    ref2 = _reference(o1b, o2b, tb, margin2, size_average=False)
    assert jnp.allclose(loss2, ref2, rtol=1e-5, atol=1e-4), (loss2, ref2)

    # --- Test 3: same bf16 case, auto-sized tile (single ragged tile),
    #             size_average=True ---
    loss3 = contrastive_loss(o1b, o2b, tb, margin=margin2, size_average=True)
    loss3 = jax.block_until_ready(loss3)
    ref3 = _reference(o1b, o2b, tb, margin2, size_average=True)
    assert jnp.allclose(loss3, ref3, rtol=1e-5, atol=1e-5), (loss3, ref3)

    print("KERNEL_OK")
</pallas_src>

<mosaic_0001>
module attributes {stable_mosaic.version = 11 : i64} {
  func.func @_contrastive_loss_kernel(%arg0: i32, %arg1: memref<8x32xf32, #tpu.memory_space<vmem>>, %arg2: memref<8x32xf32, #tpu.memory_space<vmem>>, %arg3: memref<8x1xf32, #tpu.memory_space<vmem>>, %arg4: memref<1x1x1xf32, #tpu.memory_space<vmem>>) attributes {dimension_semantics = [#tpu.dimension_semantics<parallel>], iteration_bounds = array<i64: 1>, scalar_prefetch = 0 : i64, scratch_operands = 0 : i64, tpu.core_type = #tpu.core_type<tc>, window_params = [{transform_indices = @transform_0, window_bounds = array<i64: 8, 32>}, {transform_indices = @transform_1, window_bounds = array<i64: 8, 32>}, {transform_indices = @transform_2, window_bounds = array<i64: 8, 1>}, {transform_indices = @transform_3, window_bounds = array<i64: 1, 1, 1>}]} {
    %c0 = arith.constant 0 : index
    %c0_0 = arith.constant 0 : index
    %0 = vector.load %arg1[%c0, %c0_0] : memref<8x32xf32, #tpu.memory_space<vmem>>, vector<8x32xf32>
    %c0_1 = arith.constant 0 : index
    %c0_2 = arith.constant 0 : index
    %1 = vector.load %arg2[%c0_1, %c0_2] : memref<8x32xf32, #tpu.memory_space<vmem>>, vector<8x32xf32>
    %2 = arith.subf %1, %0 : vector<8x32xf32>
    %3 = arith.mulf %2, %2 : vector<8x32xf32>
    %cst = arith.constant dense<0.000000e+00> : vector<8xf32>
    %4 = vector.multi_reduction <add>, %3, %cst [1] : vector<8x32xf32> to vector<8xf32>
    %5 = vector.shape_cast %4 : vector<8xf32> to vector<8x1xf32>
    %c0_3 = arith.constant 0 : index
    %c0_4 = arith.constant 0 : index
    %6 = vector.load %arg3[%c0_3, %c0_4] : memref<8x1xf32, #tpu.memory_space<vmem>>, vector<8x1xf32>
    %cst_5 = arith.constant 9.99999971E-10 : f32
    %7 = vector.broadcast %cst_5 : f32 to vector<8x1xf32>
    %8 = arith.addf %5, %7 : vector<8x1xf32>
    %9 = math.sqrt %8 : vector<8x1xf32>
    %cst_6 = arith.constant 1.000000e+00 : f32
    %10 = vector.broadcast %cst_6 : f32 to vector<8x1xf32>
    %11 = arith.subf %10, %9 : vector<8x1xf32>
    %cst_7 = arith.constant 0.000000e+00 : f32
    %12 = vector.broadcast %cst_7 : f32 to vector<8x1xf32>
    %13 = arith.maximumf %11, %12 : vector<8x1xf32>
    %14 = arith.mulf %6, %5 : vector<8x1xf32>
    %cst_8 = arith.constant 1.000000e+00 : f32
    %15 = vector.broadcast %cst_8 : f32 to vector<8x1xf32>
    %16 = arith.subf %15, %6 : vector<8x1xf32>
    %17 = arith.mulf %16, %13 : vector<8x1xf32>
    %18 = arith.mulf %17, %13 : vector<8x1xf32>
    %19 = arith.addf %14, %18 : vector<8x1xf32>
    %c8_i32 = arith.constant 8 : i32
    %20 = arith.muli %arg0, %c8_i32 : i32
    %21 = tpu.iota {dimensions = array<i32: 0>} : vector<8x1xi32>
    %22 = vector.broadcast %20 : i32 to vector<8x1xi32>
    %23 = arith.addi %22, %21 : vector<8x1xi32>
    %c8_i32_9 = arith.constant 8 : i32
    %24 = vector.broadcast %c8_i32_9 : i32 to vector<8x1xi32>
    %25 = arith.cmpi slt, %23, %24 : vector<8x1xi32>
    %cst_10 = arith.constant 0.000000e+00 : f32
    %26 = vector.broadcast %cst_10 : f32 to vector<8x1xf32>
    %27 = arith.select %25, %19, %26 : vector<8x1xi1>, vector<8x1xf32>
    %28 = vector.shape_cast %27 : vector<8x1xf32> to vector<1x8x1xf32>
    %cst_11 = arith.constant dense<0.000000e+00> : vector<1xf32>
    %29 = vector.multi_reduction <add>, %28, %cst_11 [1, 2] : vector<1x8x1xf32> to vector<1xf32>
    %30 = vector.shape_cast %29 : vector<1xf32> to vector<1x1x1xf32>
    %31 = vector.extract %30[0, 0, 0] : f32 from vector<1x1x1xf32>
    %32 = vector.broadcast %31 : f32 to vector<1x1x1xf32>
    %c0_12 = arith.constant 0 : index
    %c0_13 = arith.constant 0 : index
    %c0_14 = arith.constant 0 : index
    %33 = vector.load %arg4[%c0_12, %c0_13, %c0_14] : memref<1x1x1xf32, #tpu.memory_space<vmem>>, vector<1x1x1xf32>
    tpu.vector_store %arg4[%c0_12, %c0_13, %c0_14], %32 {strides = array<i32>} : memref<1x1x1xf32, #tpu.memory_space<vmem>>, vector<1x1x1xf32>,
    return
  }
  func.func @transform_0(%arg0: i32) -> (i32, i32) {
    %c0_i32 = arith.constant 0 : i32
    %c0_i32_0 = arith.constant 0 : i32
    return %arg0, %c0_i32 : i32, i32
  }
  func.func @transform_1(%arg0: i32) -> (i32, i32) {
    %c0_i32 = arith.constant 0 : i32
    %c0_i32_0 = arith.constant 0 : i32
    return %arg0, %c0_i32 : i32, i32
  }
  func.func @transform_2(%arg0: i32) -> (i32, i32) {
    %c0_i32 = arith.constant 0 : i32
    %c0_i32_0 = arith.constant 0 : i32
    return %arg0, %c0_i32 : i32, i32
  }
  func.func @transform_3(%arg0: i32) -> (i32, i32, i32) {
    %c0_i32 = arith.constant 0 : i32
    %c0_i32_0 = arith.constant 0 : i32
    %c0_i32_1 = arith.constant 0 : i32
    return %arg0, %c0_i32, %c0_i32_0 : i32, i32, i32
  }
}

</mosaic_0001>

<bundles_post_ra>
// kernel: tpu_custom_call.1
= control target key start
LH: loop header
LB: loop body
LE: loop exit
PB: predicated region body
PF: predicated region fallthrough
CT: control target
= control target key end

     0   :  { %8 = vsyncpa [#allocation3], 0  ;;  %s193_s0 = inlined_call_operand.vmem [shape: f32[8,32], index: 0, kind: input, shape index: {}]   ;;  %s194_s1 = inlined_call_operand.hbm [shape: f32[8,32], index: 1, kind: input, shape index: {}]   ;;  %s195_s2 = inlined_call_operand.vmem [shape: f32[8,1], index: 2, kind: input, shape index: {}]   ;;  %s196_s3 = inlined_call_operand.hbm [shape: f32[1,1,1], index: 3, kind: output, shape index: {}]  }
   0x1   :  { %9 = vsyncpa [#allocation4], 0  ;;  %s141_s12 = smov [#allocation2]   ;;  %s93_s16 = scalar_lea.hbm %s194_s1, 128 }
   0x2   :  { %s18_s13 = sshll.u32 %s141_s12, 4  ;;  %p94_p0 = scmp.ne.s32.totalorder %s194_s1, %s93_s16  ;;  %s19_s13 = int_to_ptr.vmem [resolvable:$true] %s18_s13 }
   0x3   :  { %p97_p1 = scmp.lt.u32.totalorder %s93_s16, %s194_s1 }
   0x5   :  { %p99_p2 = pnand %p97_p1, %p94_p0 }
   0x7   :  { %102 = shalt.err (!%p99_p2)
}
   0x8   :  { %s103_s21 = scalar_lea.vmem %s19_s13, 128  ;;  %p108_p4 = scmp.lt.s32.totalorder %s19_s13, %s19_s13 }
   0x9   :  { %p104_p3 = scmp.ne.s32.totalorder %s19_s13, %s103_s21  ;;  %p109_p5 = scmp.lt.s32.totalorder %s103_s21, %s103_s21 }
   0xb   :  { %p110_p6 = por %p109_p5, %p108_p4 }
   0xd   :  { %p111_p7 = pnand %p110_p6, %p104_p3 }
   0xf   :  { %114 = shalt.err (!%p111_p7)
}
  0x10   :  { %21 = dma.hbm_to_vmem [thread:$0]  %s194_s1, 128, %s19_s13, [#allocation3]  }
  0x11   :  { %137 = dma.done.wait [#allocation3], 128  }
  0x12   :  { %138 = vsyncadd [#allocation3], 4294967168  ;;  %v27_v0 = vld [vmem:[%s193_s0] sm:$0xff]  ;;  %vm31_vm0 = vcmask 261120   ;;  %vm58_vm3 = vcmask 7168   ;;  %s142_s0 = smov [#allocation5]  }
  0x13   :  { %v28_v1 = vld [vmem:[#allocation2] sm:$0xff]  ;;  %vm70_vm4 = vcmask 0  }
  0x14   :  { %v29_v2 = vsub.f32 %v28_v1, %v27_v0  ;;  %v35_v11 = vld [vmem:[%s195_s2] sm:$0xff]  ;;  %s78_s2 = sshll.u32 %s142_s0, 4  ;;  %s79_s2 = int_to_ptr.vmem [resolvable:$true] %s78_s2 }
  0x15   :  { %v47_v13 = vsub.f32 1.0, %v35_v11  ;;  %s115_s28 = scalar_lea.vmem %s79_s2, 16  ;;  %s119_s29 = scalar_lea.vmem %s79_s2, 32 }
  0x16   :  { %v30_v3 = vmul.f32 %v29_v2, %v29_v2  ;;  %p116_p8 = scmp.ne.s32.totalorder %s79_s2, %s115_s28  ;;  %p120_p9 = scmp.lt.s32.totalorder %s79_s2, %s79_s2 }
  0x17   :  { %p121_p10 = scmp.lt.s32.totalorder %s119_s29, %s115_s28 }
  0x18   :  { %v32_v4 = vsel %vm31_vm0, %v30_v3, 0.0 }
  0x19   :  { %33 = vadd.xlane.f32.xlu0 %v32_v4  ;;  %p122_p11 = por %p121_p10, %p120_p9 }
  0x1b   :  { %p123_p12 = pnand %p122_p11, %p116_p8 }
  0xa6   :  { %v34_v5 = vpop.xlane.xlu0 %33 }
  0xa7   :  { %v36_v6 = vadd.f32 1e-09, %v34_v5  ;;  %v46_v17 = vmul.f32 %v35_v11, %v34_v5 }
  0xa9   :  { %91 = vrsqrt.f32 %v36_v6  ;;  %vm39_vm1 = vcmp.eq.f32.partialorder %v36_v6, inf  ;;  %v42_v9 = vand.u32 2147483648, %v36_v6  ;;  %vm41_vm2 = vcmp.eq.f32.partialorder %v36_v6, 0.0 }
  0xb3   :  { %v92_v7 = vpop.eup %91 }
  0xb4   :  { %v38_v8 = vmul.f32 %v92_v7, %v36_v6 }
  0xb6   :  { %v40_v10 = vsel %vm39_vm1, %v36_v6, %v38_v8 }
  0xb7   :  { %v43_v12 = vsel %vm41_vm2, %v42_v9, %v40_v10 }
  0xb8   :  { %v44_v14 = vsub.f32 1.0, %v43_v12 }
  0xba   :  { %v45_v15 = vmax.f32 %v44_v14, 0.0 }
  0xbc   :  { %v48_v16 = vmul.f32 %v47_v13, %v45_v15 }
  0xbe   :  { %v49_v18 = vmul.f32 %v48_v16, %v45_v15 }
  0xc0   :  { %v50_v19 = vadd.f32 %v49_v18, %v46_v17 }
  0xc2   :  { %v59_v20 = vsel %vm58_vm3, %v50_v19, 0.0 }
  0xc3   :  { %60 = vadd.xlane.f32.xlu0 %v59_v20 }
 0x150   :  { %v61_v21 = vpop.xlane.xlu0 %60 }
 0x151   :  { %v62_v22 = vrot.slane %v61_v21, 4 }
 0x153   :  { %v63_v23 = vadd.f32 %v62_v22, %v61_v21 }
 0x155   :  { %v64_v24 = vrot.slane %v63_v23, 2 }
 0x157   :  { %v65_v25 = vadd.f32 %v64_v24, %v63_v23 }
 0x159   :  { %v66_v26 = vrot.slane %v65_v25, 1 }
 0x15b   :  { %v67_v27 = vadd.f32 %v66_v26, %v65_v25 }
 0x15d   :  { %87 = vpush %v67_v27 }
 0x18e   :  { %s88_s27 = spop %87 }
 0x18f   :  { %v69_v28 = vstv %s88_s27 }
 0x190   :  { %71 = vst.msk [vmem:[#allocation5] sm:$0x1] %vm70_vm4, %v69_v28 }
 0x191   :  { %126 = shalt.err (!%p123_p12)
}
 0x192   :  { %s127_s5 = scalar_lea.hbm %s196_s3, 16 }
 0x193   :  { %p128_p13 = scmp.ne.s32.totalorder %s196_s3, %s127_s5  ;;  %p131_p0 = scmp.lt.u32.totalorder %s127_s5, %s196_s3 }
 0x195   :  { %p133_p1 = pnand %p131_p0, %p128_p13 }
 0x197   :  { %136 = shalt.err (!%p133_p1)
}
 0x198   :  { %81 = dma.vmem_to_hbm [thread:$0]  %s79_s2, 16, %s196_s3, [#allocation4]  }
 0x199   :  { %139 = dma.done.wait [#allocation4], 16  }
 0x19a   :  { %140 = vsyncadd [#allocation4], 4294967280 }
 0x19b   :  { %85 = vsyncpa [#allocation3], 1 }
 0x19c   :  { %86 = vsyncpa [#allocation4], 1 }

</bundles_post_ra>
